<compile_context>
chip_gen: v5e
topology: v5e:2x2
jax: 0.10.0
libtpu: 0.0.40
codegen_flags: <defaults>
</compile_context>

<pallas_src>
import functools

import jax
import jax.numpy as jnp
from jax import lax
from jax.experimental import pallas as pl
from jax.experimental.pallas import tpu as pltpu

EPS = 1e-5


# -----------------------------------------------------------------------------
# Fused kernel: whole Expansion block, whole (small) batch resident in VMEM
# -----------------------------------------------------------------------------
def _expansion_kernel(x_ref, g1_ref, be1_ref, w1_ref, b1_ref,
                      g2_ref, be2_ref, w2_ref, b2_ref,
                      wt_ref, bt_ref, o_ref, *, H, W):
    """
    Layout: channels on sublanes; lane axis = samples concatenated along the
    flattened spatial dim (lane = n*H*W + h*W + w), so every matmul RHS and
    every store is lane-dense.

      x_ref : (Cin, N*HW) f32        g*/be*/b*/bt_ref : (C, 1) f32
      w1_ref: (Ct, 9*Cin)  bf16      w2_ref : (Ct, 9*Ct) bf16   (tap-major cols)
      wt_ref: (4*Co, Ct)   bf16      row = (2*dy + dx)*Co + co
      o_ref : (4*Co, N*HW) f32       tap-major, lane-dense upconv output
    """
    HW = H * W
    L = x_ref.shape[1]            # N * HW
    inv_cnt = 1.0 / L             # BN count per channel = N*H*W

    # ---- hoisted per-sample position iotas + per-tap border masks ------------
    lane = lax.broadcasted_iota(jnp.int32, (1, L), 1)
    pos = lane & (HW - 1)                       # per-sample flat position
    col = pos & (W - 1)                         # per-sample x coordinate
    top = pos >= W                              # valid when reading the row above
    bot = pos < HW - W                          # valid when reading the row below
    left = col >= 1                             # valid when reading the col left
    right = col <= W - 2                        # valid when reading the col right

    taps = []                                   # (lane shift, mask-or-None); reused by both convs
    for ky in range(3):
        for kx in range(3):
            oy, ox = ky - 1, kx - 1
            m = None
            for cond, active in ((top, oy == -1), (bot, oy == 1),
                                 (left, ox == -1), (right, ox == 1)):
                if active:
                    m = cond if m is None else (m & cond)
            taps.append((oy * W + ox, m))

    def bn_affine(h, g_ref, be_ref):
        # One-pass training-mode batch statistics (biased variance), f32.
        mean = jnp.sum(h, axis=1, keepdims=True) * inv_cnt
        var = jnp.maximum(
            jnp.sum(h * h, axis=1, keepdims=True) * inv_cnt - mean * mean, 0.0)
        scale = g_ref[...] * lax.rsqrt(var + EPS)       # (C, 1)
        shift = be_ref[...] - mean * scale              # (C, 1)
        return h * scale + shift

    def conv3x3_relu(hn, w_ref, b_ref):
        # pad=1 "SAME" conv as ONE K=9*C MXU matmul over an im2col tile built
        # with lane rolls + the hoisted border masks (masked lanes == zero
        # padding of the post-BN activations, matching PyTorch semantics; the
        # masks also kill any roll spill across sample boundaries).
        cols = []
        for d, m in taps:
            sh = hn if d == 0 else pltpu.roll(hn, (-d) % L, axis=1)
            cols.append(sh if m is None else jnp.where(m, sh, 0.0))
        patches = jnp.concatenate(cols, axis=0).astype(jnp.bfloat16)  # (9*C, L)
        y = jnp.dot(w_ref[...], patches,                 # (Cout, L) lane-dense
                    preferred_element_type=jnp.float32)
        return jnp.maximum(y + b_ref[...], 0.0)

    # ---- Stage 1 + 2: BN -> conv -> ReLU, whole batch per matmul --------------
    h1 = conv3x3_relu(bn_affine(x_ref[...], g1_ref, be1_ref), w1_ref, b1_ref)
    h2 = conv3x3_relu(bn_affine(h1, g2_ref, be2_ref), w2_ref, b2_ref)

    # ---- Stage 3: ConvTranspose2d(k=2, s=2): all 4 taps, all samples, 1 matmul
    y = jnp.dot(wt_ref[...], h2.astype(jnp.bfloat16),
                preferred_element_type=jnp.float32)
    o_ref[...] = (y + bt_ref[...]).astype(o_ref.dtype)   # (4*Co, L) dense store


# -----------------------------------------------------------------------------
# Wrapper: NCHW in, NCHW out; only tiny XLA transposes at the boundaries
# -----------------------------------------------------------------------------
@jax.jit
def expansion_forward(x_nchw, p):
    N, Cin, H, W = x_nchw.shape
    HW = H * W
    assert W & (W - 1) == 0 and HW & (HW - 1) == 0, \
        "W and H*W must be powers of two (lane-mask trick)"
    Ct = p["w1m"].shape[0]
    Co4 = p["wtm"].shape[0]
    Co = Co4 // 4
    L = N * HW

    # (N,Cin,H,W) -> (Cin, N*HW): samples stack along lanes; tiny XLA transpose.
    x = jnp.transpose(x_nchw.astype(jnp.float32), (1, 0, 2, 3)).reshape(Cin, L)

    # Explicit scoped-VMEM budget + scheduler cost hint for the fused call.
    buf_bytes = (4 * (Cin + Ct + Co4) * L                  # f32 in/act/out slabs
                 + 4 * 9 * max(Cin, Ct) * L                # f32 im2col tile
                 + 2 * (Ct * 9 * (Cin + Ct) + Co4 * Ct)    # bf16 weights
                 + 4 * (2 * Cin + 4 * Ct + Co4))           # BN params / biases
    vmem_limit = int(max(4 * buf_bytes, 4 << 20))          # generous headroom
    cost = pl.CostEstimate(
        flops=2 * L * (9 * Cin * Ct + 9 * Ct * Ct + Ct * Co4)
              + 16 * L * (Cin + Ct),
        transcendentals=Cin + Ct,
        bytes_accessed=4 * (Cin + Co4) * L
                       + 2 * (Ct * 9 * (Cin + Ct) + Co4 * Ct)
                       + 4 * (2 * Cin + 4 * Ct + Co4))

    y = pl.pallas_call(
        functools.partial(_expansion_kernel, H=H, W=W),
        out_shape=jax.ShapeDtypeStruct((Co4, L), jnp.float32),
        in_specs=[pl.BlockSpec(memory_space=pltpu.MemorySpace.VMEM)
                  for _ in range(11)],
        out_specs=pl.BlockSpec(memory_space=pltpu.MemorySpace.VMEM),
        compiler_params=pltpu.CompilerParams(vmem_limit_bytes=vmem_limit),
        cost_estimate=cost,
    )(x,
      p["gamma1"].reshape(Cin, 1), p["beta1"].reshape(Cin, 1),
      p["w1m"].astype(jnp.bfloat16), p["b1"].reshape(Ct, 1),
      p["gamma2"].reshape(Ct, 1), p["beta2"].reshape(Ct, 1),
      p["w2m"].astype(jnp.bfloat16), p["b2"].reshape(Ct, 1),
      p["wtm"].astype(jnp.bfloat16), p["btm"].reshape(Co4, 1))

    # (4*Co, N*HW) tap-major -> (N, Co, 2H, 2W): free reshapes + one tiny XLA
    # transpose (2x2 pixel shuffle + batch un-stack) on the ~16 KB output.
    y = y.reshape(2, 2, Co, N, H, W)
    return jnp.transpose(y, (3, 2, 4, 0, 5, 1)).reshape(N, Co, 2 * H, 2 * W)


# -----------------------------------------------------------------------------
# Deterministic parameter init (shapes per the nn.Module __init__)
# -----------------------------------------------------------------------------
def init_params(key, cin, ct, co):
    ks = jax.random.split(key, 6)

    def u(k, shape, fan_in):
        bound = fan_in ** -0.5
        return jax.random.uniform(k, shape, jnp.float32, -bound, bound)

    w1 = u(ks[0], (3, 3, cin, ct), 3 * 3 * cin)       # conv1 weight, HWIO layout
    b1 = u(ks[1], (ct,), 3 * 3 * cin)
    w2 = u(ks[2], (3, 3, ct, ct), 3 * 3 * ct)         # conv2 weight, HWIO layout
    b2 = u(ks[3], (ct,), 3 * 3 * ct)
    wt = u(ks[4], (ct, co, 2, 2), ct * 2 * 2)         # upconv weight (in, out, kH, kW)
    bt = u(ks[5], (co,), ct * 2 * 2)

    return dict(
        gamma1=jnp.ones((cin,), jnp.float32), beta1=jnp.zeros((cin,), jnp.float32),
        gamma2=jnp.ones((ct,), jnp.float32), beta2=jnp.zeros((ct,), jnp.float32),
        b1=b1, b2=b2, bt=bt,
        # kernel-packed forms (tap-major contraction / stacked-tap output rows)
        w1m=jnp.transpose(w1, (3, 0, 1, 2)).reshape(ct, 9 * cin),
        w2m=jnp.transpose(w2, (3, 0, 1, 2)).reshape(ct, 9 * ct),
        wtm=jnp.transpose(wt, (2, 3, 1, 0)).reshape(4 * co, ct),
        btm=jnp.tile(bt, 4),
        # originals kept for the pure-JAX reference check
        w1_hwio=w1, w2_hwio=w2, wt_iohw=wt,
    )


# -----------------------------------------------------------------------------
# Pure-JAX f32 reference (for correctness check only)
# -----------------------------------------------------------------------------
def reference_forward(x_nchw, p):
    x = jnp.transpose(x_nchw, (0, 2, 3, 1)).astype(jnp.float32)

    def bn(h, gamma, beta):
        m = h.mean((0, 1, 2))
        v = h.var((0, 1, 2))          # biased variance, like PyTorch training BN
        return (h - m) * lax.rsqrt(v + EPS) * gamma + beta

    def conv3(h, w, b):
        return lax.conv_general_dilated(
            h, w, window_strides=(1, 1), padding="SAME",
            dimension_numbers=("NHWC", "HWIO", "NHWC")) + b

    h1 = jax.nn.relu(conv3(bn(x, p["gamma1"], p["beta1"]), p["w1_hwio"], p["b1"]))
    h2 = jax.nn.relu(conv3(bn(h1, p["gamma2"], p["beta2"]), p["w2_hwio"], p["b2"]))

    wt = p["wt_iohw"]  # (Ct, Co, 2, 2)
    y = jnp.einsum("nhwi,iouv->nhuwvo", h2, wt)
    N, H, _, W, _, Co = y.shape
    y = y.reshape(N, 2 * H, 2 * W, Co) + p["bt"]
    return jnp.transpose(y, (0, 3, 1, 2))


if __name__ == "__main__":
    N, Cin, Ct, Co, H, W = 2, 8, 8, 4, 16, 16   # input/transition/output channels

    key = jax.random.PRNGKey(0)
    kx, kp = jax.random.split(key)
    x = jax.random.normal(kx, (N, Cin, H, W), jnp.float32)   # NCHW, like PyTorch
    params = init_params(kp, Cin, Ct, Co)

    out = jax.block_until_ready(expansion_forward(x, params))
    assert out.shape == (N, Co, 2 * H, 2 * W), out.shape

    ref = reference_forward(x, params)
    max_err = float(jnp.max(jnp.abs(out - ref)))
    # Tolerance loosened vs v2: MXU operands are bf16 (f32 accumulation) while
    # the reference is pure f32.
    if not bool(jnp.allclose(out, ref, atol=5e-2, rtol=5e-2)):
        raise AssertionError(f"Pallas result mismatch, max abs err = {max_err}")

    print("KERNEL_OK")
</pallas_src>

<mosaic_0001>
module attributes {stable_mosaic.version = 11 : i64} {
  func.func @_expansion_kernel(%arg0: memref<8x512xf32, #tpu.memory_space<vmem>>, %arg1: memref<8x1xf32, #tpu.memory_space<vmem>>, %arg2: memref<8x1xf32, #tpu.memory_space<vmem>>, %arg3: memref<8x72xbf16, #tpu.memory_space<vmem>>, %arg4: memref<8x1xf32, #tpu.memory_space<vmem>>, %arg5: memref<8x1xf32, #tpu.memory_space<vmem>>, %arg6: memref<8x1xf32, #tpu.memory_space<vmem>>, %arg7: memref<8x72xbf16, #tpu.memory_space<vmem>>, %arg8: memref<8x1xf32, #tpu.memory_space<vmem>>, %arg9: memref<16x8xbf16, #tpu.memory_space<vmem>>, %arg10: memref<16x1xf32, #tpu.memory_space<vmem>>, %arg11: memref<16x512xf32, #tpu.memory_space<vmem>>) attributes {dimension_semantics = [], scalar_prefetch = 0 : i64, scratch_operands = 0 : i64, tpu.core_type = #tpu.core_type<tc>} {
    %0 = tpu.iota {dimensions = array<i32: 1>} : vector<1x512xi32>
    %c255_i32 = arith.constant 255 : i32
    %1 = vector.broadcast %c255_i32 : i32 to vector<1x512xi32>
    %2 = arith.andi %0, %1 : vector<1x512xi32>
    %c15_i32 = arith.constant 15 : i32
    %3 = vector.broadcast %c15_i32 : i32 to vector<1x512xi32>
    %4 = arith.andi %2, %3 : vector<1x512xi32>
    %c16_i32 = arith.constant 16 : i32
    %5 = vector.broadcast %c16_i32 : i32 to vector<1x512xi32>
    %6 = arith.cmpi sge, %2, %5 : vector<1x512xi32>
    %c240_i32 = arith.constant 240 : i32
    %7 = vector.broadcast %c240_i32 : i32 to vector<1x512xi32>
    %8 = arith.cmpi slt, %2, %7 : vector<1x512xi32>
    %c1_i32 = arith.constant 1 : i32
    %9 = vector.broadcast %c1_i32 : i32 to vector<1x512xi32>
    %10 = arith.cmpi sge, %4, %9 : vector<1x512xi32>
    %c14_i32 = arith.constant 14 : i32
    %11 = vector.broadcast %c14_i32 : i32 to vector<1x512xi32>
    %12 = arith.cmpi sle, %4, %11 : vector<1x512xi32>
    %13 = arith.andi %6, %10 : vector<1x512xi1>
    %14 = arith.andi %6, %12 : vector<1x512xi1>
    %15 = arith.andi %8, %10 : vector<1x512xi1>
    %16 = arith.andi %8, %12 : vector<1x512xi1>
    %c0 = arith.constant 0 : index
    %c0_0 = arith.constant 0 : index
    %17 = vector.load %arg0[%c0, %c0_0] : memref<8x512xf32, #tpu.memory_space<vmem>>, vector<8x512xf32>
    %cst = arith.constant dense<0.000000e+00> : vector<8xf32>
    %18 = vector.multi_reduction <add>, %17, %cst [1] : vector<8x512xf32> to vector<8xf32>
    %19 = vector.shape_cast %18 : vector<8xf32> to vector<8x1xf32>
    %cst_1 = arith.constant 0.001953125 : f32
    %20 = vector.broadcast %cst_1 : f32 to vector<8x1xf32>
    %21 = arith.mulf %19, %20 : vector<8x1xf32>
    %22 = arith.mulf %17, %17 : vector<8x512xf32>
    %cst_2 = arith.constant dense<0.000000e+00> : vector<8xf32>
    %23 = vector.multi_reduction <add>, %22, %cst_2 [1] : vector<8x512xf32> to vector<8xf32>
    %24 = vector.shape_cast %23 : vector<8xf32> to vector<8x1xf32>
    %cst_3 = arith.constant 0.001953125 : f32
    %25 = vector.broadcast %cst_3 : f32 to vector<8x1xf32>
    %26 = arith.mulf %24, %25 : vector<8x1xf32>
    %27 = arith.mulf %21, %21 : vector<8x1xf32>
    %28 = arith.subf %26, %27 : vector<8x1xf32>
    %cst_4 = arith.constant 0.000000e+00 : f32
    %29 = vector.broadcast %cst_4 : f32 to vector<8x1xf32>
    %30 = arith.maximumf %28, %29 : vector<8x1xf32>
    %c0_5 = arith.constant 0 : index
    %c0_6 = arith.constant 0 : index
    %31 = vector.load %arg1[%c0_5, %c0_6] : memref<8x1xf32, #tpu.memory_space<vmem>>, vector<8x1xf32>
    %cst_7 = arith.constant 9.99999974E-6 : f32
    %32 = vector.broadcast %cst_7 : f32 to vector<8x1xf32>
    %33 = arith.addf %30, %32 : vector<8x1xf32>
    %34 = math.rsqrt %33 : vector<8x1xf32>
    %35 = arith.mulf %31, %34 : vector<8x1xf32>
    %c0_8 = arith.constant 0 : index
    %c0_9 = arith.constant 0 : index
    %36 = vector.load %arg2[%c0_8, %c0_9] : memref<8x1xf32, #tpu.memory_space<vmem>>, vector<8x1xf32>
    %37 = arith.mulf %21, %35 : vector<8x1xf32>
    %38 = arith.subf %36, %37 : vector<8x1xf32>
    %39 = vector.broadcast %35 : vector<8x1xf32> to vector<8x512xf32>
    %40 = arith.mulf %17, %39 : vector<8x512xf32>
    %41 = vector.broadcast %38 : vector<8x1xf32> to vector<8x512xf32>
    %42 = arith.addf %40, %41 : vector<8x512xf32>
    %c17_i32 = arith.constant 17 : i32
    %43 = tpu.dynamic_rotate %42 by %c17_i32 dim 1 : vector<8x512xf32>, i32 -> vector<8x512xf32>
    %cst_10 = arith.constant 0.000000e+00 : f32
    %44 = vector.shape_cast %13 : vector<1x512xi1> to vector<1x512xi1>
    %45 = vector.broadcast %44 : vector<1x512xi1> to vector<8x512xi1>
    %46 = vector.broadcast %cst_10 : f32 to vector<8x512xf32>
    %47 = arith.select %45, %43, %46 : vector<8x512xi1>, vector<8x512xf32>
    %c16_i32_11 = arith.constant 16 : i32
    %48 = tpu.dynamic_rotate %42 by %c16_i32_11 dim 1 : vector<8x512xf32>, i32 -> vector<8x512xf32>
    %cst_12 = arith.constant 0.000000e+00 : f32
    %49 = vector.shape_cast %6 : vector<1x512xi1> to vector<1x512xi1>
    %50 = vector.broadcast %49 : vector<1x512xi1> to vector<8x512xi1>
    %51 = vector.broadcast %cst_12 : f32 to vector<8x512xf32>
    %52 = arith.select %50, %48, %51 : vector<8x512xi1>, vector<8x512xf32>
    %c15_i32_13 = arith.constant 15 : i32
    %53 = tpu.dynamic_rotate %42 by %c15_i32_13 dim 1 : vector<8x512xf32>, i32 -> vector<8x512xf32>
    %cst_14 = arith.constant 0.000000e+00 : f32
    %54 = vector.shape_cast %14 : vector<1x512xi1> to vector<1x512xi1>
    %55 = vector.broadcast %54 : vector<1x512xi1> to vector<8x512xi1>
    %56 = vector.broadcast %cst_14 : f32 to vector<8x512xf32>
    %57 = arith.select %55, %53, %56 : vector<8x512xi1>, vector<8x512xf32>
    %c1_i32_15 = arith.constant 1 : i32
    %58 = tpu.dynamic_rotate %42 by %c1_i32_15 dim 1 : vector<8x512xf32>, i32 -> vector<8x512xf32>
    %cst_16 = arith.constant 0.000000e+00 : f32
    %59 = vector.shape_cast %10 : vector<1x512xi1> to vector<1x512xi1>
    %60 = vector.broadcast %59 : vector<1x512xi1> to vector<8x512xi1>
    %61 = vector.broadcast %cst_16 : f32 to vector<8x512xf32>
    %62 = arith.select %60, %58, %61 : vector<8x512xi1>, vector<8x512xf32>
    %c511_i32 = arith.constant 511 : i32
    %63 = tpu.dynamic_rotate %42 by %c511_i32 dim 1 : vector<8x512xf32>, i32 -> vector<8x512xf32>
    %cst_17 = arith.constant 0.000000e+00 : f32
    %64 = vector.shape_cast %12 : vector<1x512xi1> to vector<1x512xi1>
    %65 = vector.broadcast %64 : vector<1x512xi1> to vector<8x512xi1>
    %66 = vector.broadcast %cst_17 : f32 to vector<8x512xf32>
    %67 = arith.select %65, %63, %66 : vector<8x512xi1>, vector<8x512xf32>
    %c497_i32 = arith.constant 497 : i32
    %68 = tpu.dynamic_rotate %42 by %c497_i32 dim 1 : vector<8x512xf32>, i32 -> vector<8x512xf32>
    %cst_18 = arith.constant 0.000000e+00 : f32
    %69 = vector.shape_cast %15 : vector<1x512xi1> to vector<1x512xi1>
    %70 = vector.broadcast %69 : vector<1x512xi1> to vector<8x512xi1>
    %71 = vector.broadcast %cst_18 : f32 to vector<8x512xf32>
    %72 = arith.select %70, %68, %71 : vector<8x512xi1>, vector<8x512xf32>
    %c496_i32 = arith.constant 496 : i32
    %73 = tpu.dynamic_rotate %42 by %c496_i32 dim 1 : vector<8x512xf32>, i32 -> vector<8x512xf32>
    %cst_19 = arith.constant 0.000000e+00 : f32
    %74 = vector.shape_cast %8 : vector<1x512xi1> to vector<1x512xi1>
    %75 = vector.broadcast %74 : vector<1x512xi1> to vector<8x512xi1>
    %76 = vector.broadcast %cst_19 : f32 to vector<8x512xf32>
    %77 = arith.select %75, %73, %76 : vector<8x512xi1>, vector<8x512xf32>
    %c495_i32 = arith.constant 495 : i32
    %78 = tpu.dynamic_rotate %42 by %c495_i32 dim 1 : vector<8x512xf32>, i32 -> vector<8x512xf32>
    %cst_20 = arith.constant 0.000000e+00 : f32
    %79 = vector.shape_cast %16 : vector<1x512xi1> to vector<1x512xi1>
    %80 = vector.broadcast %79 : vector<1x512xi1> to vector<8x512xi1>
    %81 = vector.broadcast %cst_20 : f32 to vector<8x512xf32>
    %82 = arith.select %80, %78, %81 : vector<8x512xi1>, vector<8x512xf32>
    %83 = tpu.concatenate %47, %52, %57, %62, %42, %67, %72, %77, %82 in 0 : vector<8x512xf32>, vector<8x512xf32>, vector<8x512xf32>, vector<8x512xf32>, vector<8x512xf32>, vector<8x512xf32>, vector<8x512xf32>, vector<8x512xf32>, vector<8x512xf32> -> vector<72x512xf32>
    %84 = arith.truncf %83 : vector<72x512xf32> to vector<72x512xbf16>
    %c0_21 = arith.constant 0 : index
    %c0_22 = arith.constant 0 : index
    %85 = vector.load %arg3[%c0_21, %c0_22] : memref<8x72xbf16, #tpu.memory_space<vmem>>, vector<8x72xbf16>
    %cst_23 = arith.constant dense<0.000000e+00> : vector<8x512xf32>
    %86 = tpu.matmul %85, %84, %cst_23 {dimension_numbers = #tpu.dot_dimension_numbers<[1], [0], [0], [1], [0, 0, 1, 1], [], []>} : vector<8x72xbf16>, vector<72x512xbf16>, vector<8x512xf32> -> vector<8x512xf32>
    %c0_24 = arith.constant 0 : index
    %c0_25 = arith.constant 0 : index
    %87 = vector.load %arg4[%c0_24, %c0_25] : memref<8x1xf32, #tpu.memory_space<vmem>>, vector<8x1xf32>
    %88 = vector.broadcast %87 : vector<8x1xf32> to vector<8x512xf32>
    %89 = arith.addf %86, %88 : vector<8x512xf32>
    %cst_26 = arith.constant 0.000000e+00 : f32
    %90 = vector.broadcast %cst_26 : f32 to vector<8x512xf32>
    %91 = arith.maximumf %89, %90 : vector<8x512xf32>
    %cst_27 = arith.constant dense<0.000000e+00> : vector<8xf32>
    %92 = vector.multi_reduction <add>, %91, %cst_27 [1] : vector<8x512xf32> to vector<8xf32>
    %93 = vector.shape_cast %92 : vector<8xf32> to vector<8x1xf32>
    %cst_28 = arith.constant 0.001953125 : f32
    %94 = vector.broadcast %cst_28 : f32 to vector<8x1xf32>
    %95 = arith.mulf %93, %94 : vector<8x1xf32>
    %96 = arith.mulf %91, %91 : vector<8x512xf32>
    %cst_29 = arith.constant dense<0.000000e+00> : vector<8xf32>
    %97 = vector.multi_reduction <add>, %96, %cst_29 [1] : vector<8x512xf32> to vector<8xf32>
    %98 = vector.shape_cast %97 : vector<8xf32> to vector<8x1xf32>
    %cst_30 = arith.constant 0.001953125 : f32
    %99 = vector.broadcast %cst_30 : f32 to vector<8x1xf32>
    %100 = arith.mulf %98, %99 : vector<8x1xf32>
    %101 = arith.mulf %95, %95 : vector<8x1xf32>
    %102 = arith.subf %100, %101 : vector<8x1xf32>
    %cst_31 = arith.constant 0.000000e+00 : f32
    %103 = vector.broadcast %cst_31 : f32 to vector<8x1xf32>
    %104 = arith.maximumf %102, %103 : vector<8x1xf32>
    %c0_32 = arith.constant 0 : index
    %c0_33 = arith.constant 0 : index
    %105 = vector.load %arg5[%c0_32, %c0_33] : memref<8x1xf32, #tpu.memory_space<vmem>>, vector<8x1xf32>
    %cst_34 = arith.constant 9.99999974E-6 : f32
    %106 = vector.broadcast %cst_34 : f32 to vector<8x1xf32>
    %107 = arith.addf %104, %106 : vector<8x1xf32>
    %108 = math.rsqrt %107 : vector<8x1xf32>
    %109 = arith.mulf %105, %108 : vector<8x1xf32>
    %c0_35 = arith.constant 0 : index
    %c0_36 = arith.constant 0 : index
    %110 = vector.load %arg6[%c0_35, %c0_36] : memref<8x1xf32, #tpu.memory_space<vmem>>, vector<8x1xf32>
    %111 = arith.mulf %95, %109 : vector<8x1xf32>
    %112 = arith.subf %110, %111 : vector<8x1xf32>
    %113 = vector.broadcast %109 : vector<8x1xf32> to vector<8x512xf32>
    %114 = arith.mulf %91, %113 : vector<8x512xf32>
    %115 = vector.broadcast %112 : vector<8x1xf32> to vector<8x512xf32>
    %116 = arith.addf %114, %115 : vector<8x512xf32>
    %c17_i32_37 = arith.constant 17 : i32
    %117 = tpu.dynamic_rotate %116 by %c17_i32_37 dim 1 : vector<8x512xf32>, i32 -> vector<8x512xf32>
    %cst_38 = arith.constant 0.000000e+00 : f32
    %118 = vector.shape_cast %13 : vector<1x512xi1> to vector<1x512xi1>
    %119 = vector.broadcast %118 : vector<1x512xi1> to vector<8x512xi1>
    %120 = vector.broadcast %cst_38 : f32 to vector<8x512xf32>
    %121 = arith.select %119, %117, %120 : vector<8x512xi1>, vector<8x512xf32>
    %c16_i32_39 = arith.constant 16 : i32
    %122 = tpu.dynamic_rotate %116 by %c16_i32_39 dim 1 : vector<8x512xf32>, i32 -> vector<8x512xf32>
    %cst_40 = arith.constant 0.000000e+00 : f32
    %123 = vector.shape_cast %6 : vector<1x512xi1> to vector<1x512xi1>
    %124 = vector.broadcast %123 : vector<1x512xi1> to vector<8x512xi1>
    %125 = vector.broadcast %cst_40 : f32 to vector<8x512xf32>
    %126 = arith.select %124, %122, %125 : vector<8x512xi1>, vector<8x512xf32>
    %c15_i32_41 = arith.constant 15 : i32
    %127 = tpu.dynamic_rotate %116 by %c15_i32_41 dim 1 : vector<8x512xf32>, i32 -> vector<8x512xf32>
    %cst_42 = arith.constant 0.000000e+00 : f32
    %128 = vector.shape_cast %14 : vector<1x512xi1> to vector<1x512xi1>
    %129 = vector.broadcast %128 : vector<1x512xi1> to vector<8x512xi1>
    %130 = vector.broadcast %cst_42 : f32 to vector<8x512xf32>
    %131 = arith.select %129, %127, %130 : vector<8x512xi1>, vector<8x512xf32>
    %c1_i32_43 = arith.constant 1 : i32
    %132 = tpu.dynamic_rotate %116 by %c1_i32_43 dim 1 : vector<8x512xf32>, i32 -> vector<8x512xf32>
    %cst_44 = arith.constant 0.000000e+00 : f32
    %133 = vector.shape_cast %10 : vector<1x512xi1> to vector<1x512xi1>
    %134 = vector.broadcast %133 : vector<1x512xi1> to vector<8x512xi1>
    %135 = vector.broadcast %cst_44 : f32 to vector<8x512xf32>
    %136 = arith.select %134, %132, %135 : vector<8x512xi1>, vector<8x512xf32>
    %c511_i32_45 = arith.constant 511 : i32
    %137 = tpu.dynamic_rotate %116 by %c511_i32_45 dim 1 : vector<8x512xf32>, i32 -> vector<8x512xf32>
    %cst_46 = arith.constant 0.000000e+00 : f32
    %138 = vector.shape_cast %12 : vector<1x512xi1> to vector<1x512xi1>
    %139 = vector.broadcast %138 : vector<1x512xi1> to vector<8x512xi1>
    %140 = vector.broadcast %cst_46 : f32 to vector<8x512xf32>
    %141 = arith.select %139, %137, %140 : vector<8x512xi1>, vector<8x512xf32>
    %c497_i32_47 = arith.constant 497 : i32
    %142 = tpu.dynamic_rotate %116 by %c497_i32_47 dim 1 : vector<8x512xf32>, i32 -> vector<8x512xf32>
    %cst_48 = arith.constant 0.000000e+00 : f32
    %143 = vector.shape_cast %15 : vector<1x512xi1> to vector<1x512xi1>
    %144 = vector.broadcast %143 : vector<1x512xi1> to vector<8x512xi1>
    %145 = vector.broadcast %cst_48 : f32 to vector<8x512xf32>
    %146 = arith.select %144, %142, %145 : vector<8x512xi1>, vector<8x512xf32>
    %c496_i32_49 = arith.constant 496 : i32
    %147 = tpu.dynamic_rotate %116 by %c496_i32_49 dim 1 : vector<8x512xf32>, i32 -> vector<8x512xf32>
    %cst_50 = arith.constant 0.000000e+00 : f32
    %148 = vector.shape_cast %8 : vector<1x512xi1> to vector<1x512xi1>
    %149 = vector.broadcast %148 : vector<1x512xi1> to vector<8x512xi1>
    %150 = vector.broadcast %cst_50 : f32 to vector<8x512xf32>
    %151 = arith.select %149, %147, %150 : vector<8x512xi1>, vector<8x512xf32>
    %c495_i32_51 = arith.constant 495 : i32
    %152 = tpu.dynamic_rotate %116 by %c495_i32_51 dim 1 : vector<8x512xf32>, i32 -> vector<8x512xf32>
    %cst_52 = arith.constant 0.000000e+00 : f32
    %153 = vector.shape_cast %16 : vector<1x512xi1> to vector<1x512xi1>
    %154 = vector.broadcast %153 : vector<1x512xi1> to vector<8x512xi1>
    %155 = vector.broadcast %cst_52 : f32 to vector<8x512xf32>
    %156 = arith.select %154, %152, %155 : vector<8x512xi1>, vector<8x512xf32>
    %157 = tpu.concatenate %121, %126, %131, %136, %116, %141, %146, %151, %156 in 0 : vector<8x512xf32>, vector<8x512xf32>, vector<8x512xf32>, vector<8x512xf32>, vector<8x512xf32>, vector<8x512xf32>, vector<8x512xf32>, vector<8x512xf32>, vector<8x512xf32> -> vector<72x512xf32>
    %158 = arith.truncf %157 : vector<72x512xf32> to vector<72x512xbf16>
    %c0_53 = arith.constant 0 : index
    %c0_54 = arith.constant 0 : index
    %159 = vector.load %arg7[%c0_53, %c0_54] : memref<8x72xbf16, #tpu.memory_space<vmem>>, vector<8x72xbf16>
    %cst_55 = arith.constant dense<0.000000e+00> : vector<8x512xf32>
    %160 = tpu.matmul %159, %158, %cst_55 {dimension_numbers = #tpu.dot_dimension_numbers<[1], [0], [0], [1], [0, 0, 1, 1], [], []>} : vector<8x72xbf16>, vector<72x512xbf16>, vector<8x512xf32> -> vector<8x512xf32>
    %c0_56 = arith.constant 0 : index
    %c0_57 = arith.constant 0 : index
    %161 = vector.load %arg8[%c0_56, %c0_57] : memref<8x1xf32, #tpu.memory_space<vmem>>, vector<8x1xf32>
    %162 = vector.broadcast %161 : vector<8x1xf32> to vector<8x512xf32>
    %163 = arith.addf %160, %162 : vector<8x512xf32>
    %cst_58 = arith.constant 0.000000e+00 : f32
    %164 = vector.broadcast %cst_58 : f32 to vector<8x512xf32>
    %165 = arith.maximumf %163, %164 : vector<8x512xf32>
    %c0_59 = arith.constant 0 : index
    %c0_60 = arith.constant 0 : index
    %166 = vector.load %arg9[%c0_59, %c0_60] : memref<16x8xbf16, #tpu.memory_space<vmem>>, vector<16x8xbf16>
    %167 = arith.truncf %165 : vector<8x512xf32> to vector<8x512xbf16>
    %cst_61 = arith.constant dense<0.000000e+00> : vector<16x512xf32>
    %168 = tpu.matmul %166, %167, %cst_61 {dimension_numbers = #tpu.dot_dimension_numbers<[1], [0], [0], [1], [0, 0, 1, 1], [], []>} : vector<16x8xbf16>, vector<8x512xbf16>, vector<16x512xf32> -> vector<16x512xf32>
    %c0_62 = arith.constant 0 : index
    %c0_63 = arith.constant 0 : index
    %169 = vector.load %arg10[%c0_62, %c0_63] : memref<16x1xf32, #tpu.memory_space<vmem>>, vector<16x1xf32>
    %170 = vector.broadcast %169 : vector<16x1xf32> to vector<16x512xf32>
    %171 = arith.addf %168, %170 : vector<16x512xf32>
    %c0_64 = arith.constant 0 : index
    %c0_65 = arith.constant 0 : index
    %172 = vector.load %arg11[%c0_64, %c0_65] : memref<16x512xf32, #tpu.memory_space<vmem>>, vector<16x512xf32>
    tpu.vector_store %arg11[%c0_64, %c0_65], %171 {strides = array<i32>} : memref<16x512xf32, #tpu.memory_space<vmem>>, vector<16x512xf32>,
    return
  }
}

</mosaic_0001>

<bundles_post_ra>
// kernel: expansion_forward.1
= control target key start
LH: loop header
LB: loop body
LE: loop exit
PB: predicated region body
PF: predicated region fallthrough
CT: control target
= control target key end

     0   :  { %v1082_v14 = vmov 0   ;;  %s1084_s28 = smov 113   ;;  %s1086_s29 = smov 1   ;;  %v39_v50 = vlaneseq  ;;  %vm1863_vm5 = vcmask 1043456   ;;  %s1851_s0 = inlined_call_operand.vmem [shape: f32[8,512], index: 0, kind: input, shape index: {}]   ;;  %s1852_s1 = inlined_call_operand.vmem [shape: f32[8,1], index: 1, kind: input, shape index: {}]   ;;  %s1853_s2 = inlined_call_operand.vmem [shape: f32[8,1], index: 2, kind: input, shape index: {}]   ;;  %s1854_s4 = inlined_call_operand.vmem [shape: f32[8,1], index: 4, kind: input, shape index: {}]   ;;  %s1855_s3 = inlined_call_operand.vmem [shape: bf16[8,72], index: 3, kind: input, shape index: {}]   ;;  %s1856_s5 = inlined_call_operand.vmem [shape: f32[8,1], index: 5, kind: input, shape index: {}]   ;;  %s1857_s6 = inlined_call_operand.vmem [shape: f32[8,1], index: 6, kind: input, shape index: {}]   ;;  %s1858_s10 = inlined_call_operand.vmem [shape: f32[16,1], index: 10, kind: input, shape index: {}]   ;;  %s1859_s8 = inlined_call_operand.vmem [shape: f32[8,1], index: 8, kind: input, shape index: {}]   ;;  %s1860_s7 = inlined_call_operand.vmem [shape: bf16[8,72], index: 7, kind: input, shape index: {}]   ;;  %s1861_s9 = inlined_call_operand.vmem [shape: bf16[16,8], index: 9, kind: input, shape index: {}]   ;;  %s1862_s11 = inlined_call_operand.vmem [shape: f32[16,512], index: 11, kind: output, shape index: {}]  }
   0x1   :  { %v84_v0 = vld [vmem:[%s1851_s0] sm:$0xff]  ;;  %v85_v1 = vld [vmem:[%s1851_s0 + $0x8] sm:$0xff]  ;;  %v86_v2 = vld [vmem:[%s1851_s0 + $0x10] sm:$0xff]  ;;  %950 = vset.pattern.permute.xlu1 %v1082_v14  ;;  %1076 = vset.pattern.permute.xlu2 %v1082_v14  ;;  %s1087_s30 = smov 17   ;;  %s1088_s12 = smov 127  }
   0x2   :  { %v88_v3 = vadd.f32 %v85_v1, %v84_v0  ;;  %v94_v4 = vmul.f32 %v84_v0, %v84_v0  ;;  %v95_v5 = vmul.f32 %v85_v1, %v85_v1  ;;  %v87_v6 = vld [vmem:[%s1851_s0 + $0x18] sm:$0xff]  ;;  %v96_v8 = vmul.f32 %v86_v2, %v86_v2  ;;  %1077 = vset.pattern.permute.xlu0 %v1082_v14  ;;  %v107_v28 = vld [vmem:[%s1852_s1] sm:$0xff]  ;;  %s1083_s1 = smov 112   ;;  %s1089_s13 = smov 16  }
   0x3   :  { %v97_v11 = vmul.f32 %v87_v6, %v87_v6  ;;  %v120_v33 = vld [vmem:[%s1853_s2] sm:$0xff]  ;;  %s1085_s2 = smov 111   ;;  %s1090_s14 = smov 15   ;;  %v1205_v51 = vand.u32 127, %v39_v50 }
   0x4   :  { %v89_v7 = vadd.f32 %v88_v3, %v86_v2  ;;  %v98_v9 = vadd.f32 %v95_v5, %v94_v4  ;;  %v362_v49 = vld [vmem:[%s1854_s4] sm:$0xff]  ;;  %v1896_v5 = vmov 0 }
   0x5   :  { %v1208_v52 = vadd.s32 256, %v1205_v51  ;;  %v41_v54 = vadd.s32 128, %v1205_v51  ;;  %v43_v55 = vadd.s32 384, %v1205_v51  ;;  %vm1864_vm4 = vcmp.lt.s32.totalorder %v1205_v51, 111 }
   0x6   :  { %v90_v10 = vadd.f32 %v89_v7, %v87_v6  ;;  %v99_v12 = vadd.f32 %v98_v9, %v96_v8  ;;  %v44_v62 = vand.u32 255, %v1205_v51  ;;  %vm1874_vm14 = vcmp.lt.s32.totalorder %v1205_v51, 112 }
   0x7   :  { %v46_v53 = vand.u32 255, %v1208_v52  ;;  %v45_v57 = vand.u32 255, %v41_v54  ;;  %v47_v58 = vand.u32 255, %v43_v55  ;;  %vm1879_vm15 = vcmp.lt.s32.totalorder %v1205_v51, 113 }
   0x8   :  { %91 = vadd.xlane.f32.xlu0 %v90_v10  ;;  %v100_v13 = vadd.f32 %v99_v12, %v97_v11  ;;  %v1230_v4 = vand.u32 15, %v44_v62 }
   0x9   :  { %v1215_v56 = vand.u32 15, %v46_v53  ;;  %v1220_v63 = vand.u32 15, %v45_v57  ;;  %vm1232_vm6 = vcmp.lt.s32.totalorder %v45_v57, 240  ;;  %vm1237_vm8 = vcmp.lt.s32.totalorder %v47_v58, 240 }
   0xa   :  { %v1897_v5 = vsel %vm1232_vm6, 4294967295, %v1896_v5  ;;  %vm1868_vm11 = vcmp.le.s32.totalorder %v1230_v4, 14 }
   0xb   :  { %vm1875_vm3 = vcmp.le.s32.totalorder %v1215_v56, 14  ;;  %vm1866_vm7 = vcmp.le.s32.totalorder %v1220_v63, 14  ;;  %vm1869_vm13 = vcmp.ge.s32.totalorder %v1215_v56, 1 }
   0xc   :  { %vm1247_vm10 = vmand %vm1232_vm6, %vm1866_vm7  ;;  %vm1309_vm7 = vcmp.ge.s32.totalorder %v46_v53, 16 }
  0x10   :  { %101 = vadd.xlane.f32.xlu0 %v100_v13 }
  0x7b   :  { %v92_v15 = vpop.xlane.xlu0 %91 }
  0x7c   :  { %v93_v16 = vmul.f32 0.001953125, %v92_v15 }
  0x7e   :  { %v104_v18 = vmul.f32 %v93_v16, %v93_v16 }
  0x83   :  { %v102_v17 = vpop.xlane.xlu0 %101 }
  0x84   :  { %v103_v19 = vmul.f32 0.001953125, %v102_v17 }
  0x86   :  { %v105_v20 = vsub.f32 %v103_v19, %v104_v18 }
  0x88   :  { %v106_v21 = vmax.f32 %v105_v20, 0.0 }
  0x8a   :  { %v108_v22 = vadd.f32 1e-05, %v106_v21 }
  0x8c   :  { %1078 = vrsqrt.f32 %v108_v22  ;;  %vm115_vm1 = vweird.f32 %v108_v22 }
  0x92   :  { %v1079_v23 = vpop.eup %1078 }
  0x93   :  { %v110_v24 = vmul.f32 %v1079_v23, %v108_v22  ;;  %vm116_vm0 = vweird.f32 %v1079_v23 }
  0x94   :  { %vm117_vm2 = vmor %vm115_vm1, %vm116_vm0  ;;  %vm1867_vm0 = vcmp.lt.s32.totalorder %v1205_v51, 127  ;;  %vm1872_vm1 = vmmov 1  }
  0x95   :  { %v111_v25 = vmul.f32 %v1079_v23, %v110_v24 }
  0x97   :  { %v112_v26 = vmul.f32 0.5, %v111_v25 }
  0x99   :  { %v113_v27 = vsub.f32 1.5, %v112_v26 }
  0x9b   :  { %v114_v29 = vmul.f32 %v1079_v23, %v113_v27 }
  0x9d   :  { %v118_v30 = vsel %vm117_vm2, %v1079_v23, %v114_v29  ;;  %vm1290_vm2 = vmpackc.low %vm1872_vm1, %vm1869_vm13 }
  0x9e   :  { %v119_v31 = vmul.f32 %v118_v30, %v107_v28 }
  0xa0   :  { %125 = vperm.xlu1 %950, %v119_v31   ;;  %v121_v32 = vmul.f32 %v119_v31, %v93_v16 }
  0xa2   :  { %v122_v34 = vsub.f32 %v120_v33, %v121_v32 }
  0xa8   :  { %134 = vperm.xlu1 %950, %v122_v34  }
 0x112   :  { %v126_v35 = vpop.permute.xlu1 %125 }
 0x113   :  { %v130_v36 = vmul.f32 %v126_v35, %v86_v2  ;;  %v131_v37 = vmul.f32 %v126_v35, %v87_v6  ;;  %v128_v42 = vmul.f32 %v126_v35, %v84_v0  ;;  %v129_v43 = vmul.f32 %v126_v35, %v85_v1 }
 0x114   :  { %v1222_v0 = vand.u32 15, %v47_v58 }
 0x116   :  { %vm1865_vm9 = vcmp.le.s32.totalorder %v1222_v0, 14 }
 0x117   :  { %vm1256_vm12 = vmand %vm1237_vm8, %vm1865_vm9 }
 0x118   :  { %vm1303_vm9 = vmpackc.low %vm1875_vm3, %vm1872_vm1 }
 0x11a   :  { %v135_v38 = vpop.permute.xlu1 %134 }
 0x11b   :  { %v1170_v39 = vadd.f32 %v135_v38, %v130_v36  ;;  %v1172_v40 = vadd.f32 %v135_v38, %v131_v37  ;;  %v1179_v44 = vadd.f32 %v135_v38, %v128_v42  ;;  %v1181_v45 = vadd.f32 %v135_v38, %v129_v43 }
 0x11c   :  { %v1904_v37 = vmov 0 }
 0x11d   :  { %v966_v41 = vpack.i.bf16 %v1172_v40, %v1170_v39  ;;  %v996_v46 = vpack.i.bf16 %v1170_v39, %v1181_v45  ;;  %v976_v47 = vpack.i.bf16 %v1181_v45, %v1179_v44  ;;  %v1026_v48 = vpack.i.bf16 %v1179_v44, %v1172_v40 }
 0x11e   :  { %v1905_v37 = vsel %vm1290_vm2, 4294967295, %v1904_v37 }
 0x11f   :  { %967 = vrot.lane.b32.xlu1 %v966_v41, %s1083_s1  ;;  %962 = vrot.lane.b32.xlu0 %v966_v41, %s1084_s28 }
 0x120   :  { %952 = vrot.lane.b32.xlu2 %v966_v41, %s1085_s2 }
 0x127   :  { %997 = vrot.lane.b32.xlu0 %v996_v46, %s1086_s29  ;;  %977 = vrot.lane.b32.xlu1 %v976_v47, %s1083_s1 }
 0x128   :  { %957 = vrot.lane.b32.xlu2 %v976_v47, %s1085_s2 }
 0x12f   :  { %1012 = vrot.lane.b32.xlu0 %v996_v46, %s1087_s30  ;;  %987 = vrot.lane.b32.xlu1 %v976_v47, %s1088_s12 }
 0x130   :  { %972 = vrot.lane.b32.xlu2 %v976_v47, %s1084_s28 }
 0x137   :  { %1027 = vrot.lane.b32.xlu0 %v1026_v48, %s1089_s13  ;;  %1002 = vrot.lane.b32.xlu1 %v1026_v48, %s1090_s14 }
 0x138   :  { %982 = vrot.lane.b32.xlu2 %v966_v41, %s1088_s12 }
 0x13f   :  { %1017 = vrot.lane.b32.xlu1 %v996_v46, %s1089_s13 }
 0x140   :  { %992 = vrot.lane.b32.xlu2 %v996_v46, %s1090_s14  ;;  %v1906_v46 = vmov 0 }
 0x141   :  { %v1907_v46 = vsel %vm1303_vm9, 4294967295, %v1906_v46 }
 0x147   :  { %365 = vperm.xlu1 %950, %v362_v49   ;;  %v1912_v49 = vmov 0 }
 0x148   :  { %1007 = vrot.lane.b32.xlu2 %v1026_v48, %s1086_s29 }
 0x150   :  { %1022 = vrot.lane.b32.xlu2 %v1026_v48, %s1087_s30  ;;  %v1910_v48 = vmov 0 }
 0x17a   :  { %v953_v59 = vpop.permute.xlu2 %952 }
 0x17b   :  { %v955_v60 = vunpack.i.h.bf16 %v953_v59  ;;  %v954_v61 = vunpack.i.l.bf16 %v953_v59 }
 0x17d   :  { %v325_v1 = vsel %vm1864_vm4, %v954_v61, %v955_v60 }
 0x17e   :  { %v339_v2 = vsel %vm1875_vm3, %v325_v1, 0.0 }
 0x17f   :  { %v359_v3 = vpack.c.bf16 %v339_v2, %v339_v2 }
 0x181   :  { %v380_v7 = vsel %vm1863_vm5, %v359_v3, 0 }
 0x182   :  { %414 = vmatpush.bf16.msra.mxu2 %v380_v7  ;;  %v958_v8 = vpop.permute.xlu2 %957 }
 0x183   :  { %v960_v10 = vunpack.i.h.bf16 %v958_v8  ;;  %v959_v11 = vunpack.i.l.bf16 %v958_v8 }
 0x185   :  { %v327_v13 = vsel %vm1864_vm4, %v959_v11, %v960_v10  ;;  %v326_v14 = vsel %vm1864_vm4, %v960_v10, %v954_v61  ;;  %v328_v15 = vsel %vm1864_vm4, %v955_v60, %v959_v11  ;;  %vm1871_vm4 = vcmp.ge.s32.totalorder %v1220_v63, 1 }
 0x186   :  { %v337_v16 = vsel %vm1868_vm11, %v327_v13, 0.0  ;;  %v338_v17 = vsel %vm1247_vm10, %v326_v14, 0.0  ;;  %v340_v18 = vsel %vm1256_vm12, %v328_v15, 0.0  ;;  %vm1876_vm11 = vcmp.ge.s32.totalorder %v1222_v0, 1  ;;  %vm1327_vm13 = vmand %vm1232_vm6, %vm1871_vm4 }
 0x187   :  { %v357_v19 = vpack.c.bf16 %v337_v16, %v337_v16  ;;  %v358_v20 = vpack.c.bf16 %v338_v17, %v338_v17  ;;  %v360_v21 = vpack.c.bf16 %v340_v18, %v340_v18  ;;  %v1913_v49 = vsel %vm1327_vm13, 4294967295, %v1912_v49 }
 0x188   :  { %v1921_v13 = vmov 0 }
 0x189   :  { %v374_v22 = vsel %vm1863_vm5, %v357_v19, 0  ;;  %v377_v23 = vsel %vm1863_vm5, %v358_v20, 0  ;;  %v383_v24 = vsel %vm1863_vm5, %v360_v21, 0  ;;  %vm1870_vm5 = vcmp.ge.s32.totalorder %v1230_v4, 1 }
 0x18a   :  { %v973_v25 = vpop.permute.xlu2 %972  ;;  %388 = vmatpush.bf16.msra.mxu0 %v374_v22  ;;  %401 = vmatpush.bf16.msra.mxu1 %v377_v23 }
 0x18b   :  { %427 = vmatpush.bf16.msra.mxu3 %v383_v24  ;;  %v975_v38 = vunpack.i.h.bf16 %v973_v25  ;;  %v974_v41 = vunpack.i.l.bf16 %v973_v25  ;;  %v1927_v25 = vmov 0 }
 0x18d   :  { %v277_v54 = vsel %vm1879_vm15, %v974_v41, %v975_v38 }
 0x191   :  { %v968_v26 = vpop.permute.xlu1 %967  ;;  %v963_v27 = vpop.permute.xlu0 %962 }
 0x192   :  { %v970_v28 = vunpack.i.h.bf16 %v968_v26  ;;  %v969_v29 = vunpack.i.l.bf16 %v968_v26  ;;  %v965_v30 = vunpack.i.h.bf16 %v963_v27  ;;  %v964_v31 = vunpack.i.l.bf16 %v963_v27  ;;  %v1277_v32 = vpop.permute.xlu2 %982 }
 0x193   :  { %v985_v33 = vunpack.i.h.bf16 %v1277_v32  ;;  %v984_v34 = vunpack.i.l.bf16 %v1277_v32 }
 0x194   :  { %v275_v35 = vsel %vm1879_vm15, %v964_v31, %v965_v30  ;;  %v300_v36 = vsel %vm1874_vm14, %v969_v29, %v970_v28  ;;  %vm1352_vm14 = vmand %vm1237_vm8, %vm1876_vm11  ;;  %v276_v3 = vsel %vm1879_vm15, %v975_v38, %v964_v31  ;;  %v278_v7 = vsel %vm1879_vm15, %v965_v30, %v974_v41 }
 0x195   :  { %v854_v42 = vpack.c.bf16 %v300_v36, %v275_v35  ;;  %v250_v43 = vsel %vm1867_vm0, %v984_v34, %v985_v33  ;;  %vm1318_vm0 = vmpackc.low %vm1872_vm1, %vm1870_vm5  ;;  %vm1882_vm1 = vcmp.lt.s32.totalorder %v1205_v51, 1  ;;  %vm1918_vm11 = vcmp.lt.s32.totalorder %v1205_v51, 112 }
 0x196   :  { %v1911_v48 = vsel %vm1318_vm0, 4294967295, %v1910_v48  ;;  %v857_v53 = vpack.c.bf16 %v250_v43, %v1170_v39  ;;  %vm1340_vm5 = vmand %vm1309_vm7, %vm1875_vm3  ;;  %v1935_v30 = vmov 0  ;;  %v1938_v35 = vmov 0 }
 0x197   :  { %855 = vmatpush.bf16.msk.msra.mxu2 %vm1290_vm2, %v854_v42  ;;  %vm1880_vm3 = vmpackc.low %vm1232_vm6, %vm1327_vm13  ;;  %vm1430_vm13 = vcmp.ge.s32.totalorder %v44_v62, 16 }
 0x198   :  { %vm1919_vm4 = vmmov %vm1918_vm11  ;;  %v1936_v30 = vsel %vm1430_vm13, 4294967295, %v1935_v30 }
 0x199   :  { %v1331_v50 = vpop.permute.xlu0 %997  ;;  %v978_v52 = vpop.permute.xlu1 %977  ;;  %vm1923_vm15 = vmmov %vm1919_vm4 }
 0x19a   :  { %v1000_v57 = vunpack.i.h.bf16 %v1331_v50  ;;  %v999_v58 = vunpack.i.l.bf16 %v1331_v50  ;;  %v980_v39 = vunpack.i.h.bf16 %v978_v52  ;;  %v979_v59 = vunpack.i.l.bf16 %v978_v52  ;;  %v993_v60 = vpop.permute.xlu2 %992 }
 0x19b   :  { %v995_v1 = vunpack.i.h.bf16 %v993_v60  ;;  %v994_v2 = vunpack.i.l.bf16 %v993_v60  ;;  %858 = vmatpush.bf16.msk.msra.mxu2 %vm1303_vm9, %v857_v53  ;;  %vm1920_vm9 = vcmp.ge.s32.totalorder %v1215_v56, 1  ;;  %v1959_v50 = vmov 0 }
 0x19c   :  { %v302_v8 = vsel %vm1918_vm11, %v979_v59, %v980_v39  ;;  %v301_v10 = vsel %vm1919_vm4, %v980_v39, %v969_v29  ;;  %v226_v11 = vsel %vm1882_vm1, %v999_v58, %v1000_v57  ;;  %vm1378_vm2 = vmpackc.low %vm1920_vm9, %vm1340_vm5  ;;  %v303_v14 = vsel %vm1923_vm15, %v970_v28, %v979_v59 }
 0x19d   :  { %v1922_v13 = vsel %vm1378_vm2, 4294967295, %v1921_v13  ;;  %v828_v15 = vpack.c.bf16 %v302_v8, %v277_v54  ;;  %v841_v16 = vpack.c.bf16 %v301_v10, %v276_v3  ;;  %vm1924_vm4 = vcmp.lt.s32.totalorder %v1205_v51, 15  ;;  %vm1881_vm11 = vmpackc.low %vm1237_vm8, %vm1352_vm14 }
 0x19e   :  { %v201_v17 = vsel %vm1924_vm4, %v994_v2, %v995_v1  ;;  %v867_v18 = vpack.c.bf16 %v303_v14, %v278_v7  ;;  %vm1925_vm5 = vmmov 1   ;;  %vm1926_vm9 = vcmp.le.s32.totalorder %v1230_v4, 14  ;;  %v642_v7 = vld [vmem:[%s1860_s7] sm:$0xf] }
 0x19f   :  { %v860_v19 = vpack.c.bf16 %v226_v11, %v201_v17  ;;  %829 = vmatpush.bf16.msk.msra.mxu0 %vm1318_vm0, %v828_v15  ;;  %842 = vmatpush.bf16.msk.msra.mxu1 %vm1880_vm3, %v841_v16  ;;  %vm1409_vm15 = vmpackc.low %vm1926_vm9, %vm1925_vm5  ;;  %vm1929_vm4 = vcmp.lt.s32.totalorder %v1205_v51, 127  ;;  %v1932_v28 = vmov 0  ;;  %vm1947_vm0 = vcmp.ge.s32.totalorder %v1220_v63, 1 }
 0x1a0   :  { %868 = vmatpush.bf16.msk.msra.mxu3 %vm1881_vm11, %v867_v18  ;;  %v1928_v25 = vsel %vm1409_vm15, 4294967295, %v1927_v25  ;;  %vm1930_vm3 = vmmov %vm1929_vm4  ;;  %vm1931_vm11 = vcmp.le.s32.totalorder %v1220_v63, 14  ;;  %v1948_v39 = vmov 0 }
 0x1a1   :  { %861 = vmatpush.bf16.msk.msra.mxu2 %vm1378_vm2, %v860_v19  ;;  %v1404_v20 = vpop.permute.xlu0 %1012  ;;  %v988_v21 = vpop.permute.xlu1 %987  ;;  %vm1420_vm1 = vmpackc.low %vm1931_vm11, %vm1925_vm5 }
 0x1a2   :  { %v990_v22 = vunpack.i.h.bf16 %v988_v21  ;;  %v989_v23 = vunpack.i.l.bf16 %v988_v21  ;;  %v1008_v24 = vpop.permute.xlu2 %1007  ;;  %v1933_v28 = vsel %vm1420_vm1, 4294967295, %v1932_v28  ;;  %vm1934_vm9 = vmmov %vm1930_vm3  ;;  %v1014_v14 = vunpack.i.l.bf16 %v1404_v20 }
 0x1a3   :  { %v1009_v36 = vunpack.i.l.bf16 %v1008_v24 }
 0x1a4   :  { %v252_v26 = vsel %vm1929_vm4, %v989_v23, %v990_v22  ;;  %v251_v27 = vsel %vm1930_vm3, %v990_v22, %v984_v34  ;;  %v253_v29 = vsel %vm1934_vm9, %v985_v33, %v989_v23  ;;  %vm1937_vm3 = vcmp.le.s32.totalorder %v1222_v0, 14 }
 0x1a5   :  { %v831_v31 = vpack.c.bf16 %v252_v26, %v1179_v44  ;;  %v844_v34 = vpack.c.bf16 %v251_v27, %v1181_v45  ;;  %vm1439_vm11 = vmpackc.low %vm1937_vm3, %vm1925_vm5  ;;  %v870_v32 = vpack.c.bf16 %v253_v29, %v1172_v40  ;;  %v1010_v33 = vunpack.i.h.bf16 %v1008_v24 }
 0x1a6   :  { %v1939_v35 = vsel %vm1439_vm11, 4294967295, %v1938_v35  ;;  %vm1940_vm4 = vcmp.le.s32.totalorder %v1230_v4, 14  ;;  %vm1946_vm3 = vcmp.le.s32.totalorder %v1220_v63, 14 }
 0x1a7   :  { %832 = vmatpush.bf16.msk.msra.mxu0 %vm1409_vm15, %v831_v31  ;;  %845 = vmatpush.bf16.msk.msra.mxu1 %vm1420_vm1, %v844_v34  ;;  %vm72_vm9 = vmand %vm1430_vm13, %vm1940_vm4  ;;  %vm1941_vm15 = vcmp.ge.s32.totalorder %v1230_v4, 1  ;;  %vm1944_vm4 = vcmp.lt.s32.totalorder %v1205_v51, 1 }
 0x1a8   :  { %871 = vmatpush.bf16.msk.msra.mxu3 %vm1439_vm11, %v870_v32  ;;  %vm1457_vm1 = vmpackc.low %vm1941_vm15, %vm72_vm9  ;;  %v228_v54 = vsel %vm1944_vm4, %v1009_v36, %v1010_v33  ;;  %vm1950_vm15 = vcmp.lt.s32.totalorder %v1205_v51, 15 }
 0x1a9   :  { %v1028_v44 = vpop.permute.xlu0 %1027  ;;  %v1003_v45 = vpop.permute.xlu1 %1002  ;;  %vm1945_vm6 = vmmov %vm1944_vm4 }
 0x1aa   :  { %v1030_v40 = vunpack.i.h.bf16 %v1028_v44  ;;  %v1029_v62 = vunpack.i.l.bf16 %v1028_v44  ;;  %v1005_v38 = vunpack.i.h.bf16 %v1003_v45  ;;  %v1004_v41 = vunpack.i.l.bf16 %v1003_v45  ;;  %v1023_v42 = vpop.permute.xlu2 %1022  ;;  %vm1469_vm2 = vmpackc.low %vm1947_vm0, %vm1946_vm3 }
 0x1ab   :  { %v1025_v52 = vunpack.i.h.bf16 %v1023_v42  ;;  %v1024_v53 = vunpack.i.l.bf16 %v1023_v42  ;;  %v227_v55 = vsel %vm1945_vm6, %v1010_v33, %v999_v58  ;;  %v1949_v39 = vsel %vm1469_vm2, 4294967295, %v1948_v39  ;;  %vm1951_vm9 = vmmov %vm1950_vm15 }
 0x1ac   :  { %v203_v59 = vsel %vm1950_vm15, %v1004_v41, %v1005_v38  ;;  %v202_v60 = vsel %vm1951_vm9, %v1005_v38, %v994_v2  ;;  %vm1952_vm11 = vmmov %vm1951_vm9  ;;  %vm1955_vm0 = vcmp.ge.s32.totalorder %v1222_v0, 1  ;;  %vm1958_vm15 = vcmp.ge.s32.totalorder %v1230_v4, 1 }
 0x1ad   :  { %v200_v3 = vsel %vm1952_vm11, %v995_v1, %v1004_v41  ;;  %vm1953_vm6 = vmmov %vm1944_vm4  ;;  %vm1954_vm4 = vcmp.le.s32.totalorder %v1222_v0, 14  ;;  %v834_v8 = vpack.c.bf16 %v228_v54, %v203_v59  ;;  %v847_v10 = vpack.c.bf16 %v227_v55, %v202_v60 }
 0x1ae   :  { %v225_v58 = vsel %vm1953_vm6, %v1000_v57, %v1009_v36  ;;  %vm1487_vm3 = vmpackc.low %vm1955_vm0, %vm1954_vm4  ;;  %vm1895_vm9 = vcmp.lt.s32.totalorder %v1205_v51, 17  ;;  %vm1961_vm6 = vcmp.lt.s32.totalorder %v1205_v51, 16  ;;  %v1015_v2 = vunpack.i.h.bf16 %v1404_v20  ;;  %v361_v20 = vld [vmem:[%s1855_s3] sm:$0xf] }
 0x1af   :  { %v873_v11 = vpack.c.bf16 %v225_v58, %v200_v3  ;;  %vm1495_vm11 = vmand %vm1430_vm13, %vm1958_vm15  ;;  %v153_v57 = vsel %vm1895_vm9, %v1024_v53, %v1025_v52  ;;  %v178_v1 = vsel %vm1961_vm6, %v1029_v62, %v1030_v40  ;;  %835 = vmatpush.bf16.msk.msra.mxu0 %vm1457_vm1, %v834_v8  ;;  %848 = vmatpush.bf16.msk.msra.mxu1 %vm1469_vm2, %v847_v10  ;;  %vm1962_vm0 = vcmp.ge.s32.totalorder %v1215_v56, 1 }
 0x1b0   :  { %v1960_v50 = vsel %vm1495_vm11, 4294967295, %v1959_v50  ;;  %vm1891_vm4 = vmpackc.low %vm1430_vm13, %vm1495_vm11  ;;  %v837_v16 = vpack.c.bf16 %v178_v1, %v153_v57  ;;  %v152_v21 = vsel %vm1895_vm9, %v1025_v52, %v1014_v14  ;;  %v151_v23 = vsel %vm1895_vm9, %v1014_v14, %v1015_v2 }
 0x1b1   :  { %874 = vmatpush.bf16.msk.msra.mxu3 %vm1487_vm3, %v873_v11  ;;  %v1018_v15 = vpop.permute.xlu1 %1017  ;;  %vm1520_vm15 = vmand %vm1309_vm7, %vm1962_vm0  ;;  %vm1965_vm0 = vcmp.ge.s32.totalorder %v1220_v63, 1  ;;  %v150_v63 = vsel %vm1895_vm9, %v1015_v2, %v1024_v53  ;;  %vm1971_vm13 = vcmp.ge.s32.totalorder %v1222_v0, 1  ;;  %vm1983_vm9 = vcmp.le.s32.totalorder %v1215_v56, 14 }
 0x1b2   :  { %v1020_v18 = vunpack.i.h.bf16 %v1018_v15  ;;  %v1019_v19 = vunpack.i.l.bf16 %v1018_v15  ;;  %vm1537_vm2 = vmpackc.low %vm1925_vm5, %vm1965_vm0 }
 0x1b3   :  { %838 = vmatpush.bf16.msk.msra.mxu0 %vm1891_vm4, %v837_v16  ;;  %vm1968_vm4 = vmmov %vm1961_vm6 }
 0x1b4   :  { %v177_v24 = vsel %vm1968_vm4, %v1030_v40, %v1019_v19  ;;  %vm1969_vm11 = vmmov %vm1968_vm4 }
 0x1b5   :  { %v176_v26 = vsel %vm1969_vm11, %v1019_v19, %v1020_v18  ;;  %vm1894_vm6 = vmpackc.low %vm1309_vm7, %vm1520_vm15  ;;  %v850_v29 = vpack.c.bf16 %v177_v24, %v152_v21  ;;  %vm1974_vm11 = vcmask 588800  }
 0x1b6   :  { %vm1970_vm0 = vmmov %vm1968_vm4  ;;  %v863_v31 = vpack.c.bf16 %v176_v26, %v151_v23  ;;  %839 = vmatmul.msk.bf16.vlgmr.msra.gmra.mxu0 %vm1974_vm11, %v361_v20 }
 0x1b7   :  { %v175_v27 = vsel %vm1970_vm0, %v1020_v18, %v1029_v62  ;;  %vm1558_vm4 = vmpackc.low %vm1925_vm5, %vm1971_vm13  ;;  %851 = vmatpush.bf16.msk.msra.mxu1 %vm1537_vm2, %v850_v29 }
 0x1b8   :  { %v876_v32 = vpack.c.bf16 %v175_v27, %v150_v63  ;;  %864 = vmatpush.bf16.msk.msra.mxu2 %vm1894_vm6, %v863_v31  ;;  %vm1975_vm0 = vmmov %vm1974_vm11  ;;  %vm1982_vm6 = vcmp.le.s32.totalorder %v1230_v4, 14 }
 0x1b9   :  { %vm1976_vm13 = vmmov %vm1975_vm0  ;;  %v366_v33 = vpop.permute.xlu1 %365 }
 0x1ba   :  { %877 = vmatpush.bf16.msk.msra.mxu3 %vm1558_vm4, %v876_v32  ;;  %852 = vmatmul.msk.bf16.vlgmr.msra.gmra.mxu1 %vm1975_vm0, %v361_v20  ;;  %vm1977_vm5 = vmmov %vm1975_vm0 }
 0x1bb   :  { %865 = vmatmul.msk.bf16.vlgmr.msra.gmra.mxu2 %vm1976_vm13, %v361_v20 }
 0x1bd   :  { %878 = vmatmul.msk.bf16.vlgmr.msra.gmra.mxu3 %vm1977_vm5, %v361_v20  ;;  %vm1978_vm5 = vcmp.lt.s32.totalorder %v1205_v51, 111 }
 0x233   :  { %v394_v0 = vpop.f32.mrf.mxu0 }
 0x234   :  { %v395_v44 = vadd.f32 %v394_v0, %v366_v33 }
 0x236   :  { %v437_v38 = vmax.f32 %v395_v44, 0.0 }
 0x237   :  { %v407_v36 = vpop.f32.mrf.mxu1 }
 0x238   :  { %v408_v45 = vadd.f32 %v407_v36, %v366_v33  ;;  %v447_v59 = vmul.f32 %v437_v38, %v437_v38 }
 0x23a   :  { %v438_v40 = vmax.f32 %v408_v45, 0.0 }
 0x23b   :  { %v396_v62 = vpop.f32.mrf.mxu0 }
 0x23c   :  { %v448_v42 = vmul.f32 %v438_v40, %v438_v40  ;;  %v441_v3 = vadd.f32 %v438_v40, %v437_v38 }
 0x23e   :  { %v420_v41 = vpop.f32.mrf.mxu2  ;;  %v451_v11 = vadd.f32 %v448_v42, %v447_v59 }
 0x23f   :  { %v421_v52 = vadd.f32 %v420_v41, %v366_v33  ;;  %v409_v55 = vpop.f32.mrf.mxu1  ;;  %v473_v41 = vld [vmem:[%s1857_s6] sm:$0xff] }
 0x240   :  { %v433_v53 = vpop.f32.mrf.mxu3 }
 0x241   :  { %v434_v54 = vadd.f32 %v433_v53, %v366_v33  ;;  %v439_v60 = vmax.f32 %v421_v52, 0.0  ;;  %v460_v33 = vld [vmem:[%s1856_s5] sm:$0xff] }
 0x243   :  { %v440_v58 = vmax.f32 %v434_v54, 0.0  ;;  %v442_v8 = vadd.f32 %v441_v3, %v439_v60  ;;  %v449_v10 = vmul.f32 %v439_v60, %v439_v60 }
 0x245   :  { %v443_v57 = vadd.f32 %v442_v8, %v440_v58  ;;  %v450_v1 = vmul.f32 %v440_v58, %v440_v58  ;;  %v452_v2 = vadd.f32 %v451_v11, %v449_v10 }
 0x246   :  { %v422_v14 = vpop.f32.mrf.mxu2 }
 0x247   :  { %444 = vadd.xlane.f32.xlu2 %v443_v57  ;;  %v453_v16 = vadd.f32 %v452_v2, %v450_v1 }
 0x248   :  { %v435_v15 = vpop.f32.mrf.mxu3 }
 0x249   :  { %454 = vadd.xlane.f32.xlu0 %v453_v16 }
 0x2ba   :  { %v445_v18 = vpop.xlane.xlu2 %444 }
 0x2bb   :  { %v446_v19 = vmul.f32 0.001953125, %v445_v18 }
 0x2bc   :  { %v455_v20 = vpop.xlane.xlu0 %454 }
 0x2bd   :  { %v457_v21 = vmul.f32 %v446_v19, %v446_v19  ;;  %v456_v23 = vmul.f32 0.001953125, %v455_v20 }
 0x2bf   :  { %v458_v24 = vsub.f32 %v456_v23, %v457_v21 }
 0x2c1   :  { %v459_v26 = vmax.f32 %v458_v24, 0.0 }
 0x2c3   :  { %v461_v63 = vadd.f32 1e-05, %v459_v26 }
 0x2c5   :  { %1080 = vrsqrt.f32 %v461_v63  ;;  %vm468_vm0 = vweird.f32 %v461_v63 }
 0x2cb   :  { %v1081_v27 = vpop.eup %1080 }
 0x2cc   :  { %v463_v29 = vmul.f32 %v1081_v27, %v461_v63  ;;  %vm469_vm11 = vweird.f32 %v1081_v27 }
 0x2cd   :  { %vm470_vm13 = vmor %vm468_vm0, %vm469_vm11 }
 0x2ce   :  { %v464_v31 = vmul.f32 %v1081_v27, %v463_v29  ;;  %vm1979_vm11 = vmmov %vm1978_vm5 }
 0x2cf   :  { %vm1980_vm0 = vmmov %vm1978_vm5 }
 0x2d0   :  { %v465_v32 = vmul.f32 0.5, %v464_v31 }
 0x2d2   :  { %v466_v0 = vsub.f32 1.5, %v465_v32 }
 0x2d4   :  { %v467_v36 = vmul.f32 %v1081_v27, %v466_v0 }
 0x2d6   :  { %v471_v44 = vsel %vm470_vm13, %v1081_v27, %v467_v36  ;;  %vm1981_vm13 = vmmov %vm1980_vm0 }
 0x2d7   :  { %v472_v45 = vmul.f32 %v471_v44, %v460_v33 }
 0x2d9   :  { %478 = vperm.xlu1 %950, %v472_v45   ;;  %v474_v62 = vmul.f32 %v472_v45, %v446_v19 }
 0x2db   :  { %v475_v42 = vsub.f32 %v473_v41, %v474_v62 }
 0x2e1   :  { %487 = vperm.xlu1 %950, %v475_v42  }
 0x34b   :  { %v479_v52 = vpop.permute.xlu1 %478 }
 0x34c   :  { %v481_v53 = vmul.f32 %v479_v52, %v437_v38  ;;  %v483_v54 = vmul.f32 %v479_v52, %v439_v60  ;;  %v484_v55 = vmul.f32 %v479_v52, %v440_v58  ;;  %v482_v11 = vmul.f32 %v479_v52, %v438_v40  ;;  %v727_v60 = vld [vmem:[%s1858_s10 + $0x8] sm:$0xff] }
 0x353   :  { %v488_v59 = vpop.permute.xlu1 %487 }
 0x354   :  { %v1581_v3 = vadd.f32 %v488_v59, %v481_v53  ;;  %v1583_v8 = vadd.f32 %v488_v59, %v483_v54  ;;  %v1585_v10 = vadd.f32 %v488_v59, %v484_v55  ;;  %v1591_v1 = vadd.f32 %v488_v59, %v482_v11 }
 0x356   :  { %580 = vrot.lane.b32.xlu2 %v1585_v10, %s1084_s28  ;;  %v1046_v57 = vpack.i.bf16 %v1583_v8, %v1581_v3  ;;  %v1056_v38 = vpack.i.bf16 %v1583_v8, %v1591_v1  ;;  %v1036_v40 = vpack.i.bf16 %v1591_v1, %v1585_v10 }
 0x358   :  { %1047 = vrot.lane.b32.xlu0 %v1046_v57, %s1083_s1  ;;  %1032 = vrot.lane.b32.xlu1 %v1046_v57, %s1085_s2 }
 0x35e   :  { %1057 = vrot.lane.b32.xlu2 %v1056_v38, %s1090_s14 }
 0x360   :  { %532 = vrot.lane.b32.xlu0 %v1585_v10, %s1090_s14  ;;  %1037 = vrot.lane.b32.xlu1 %v1036_v40, %s1085_s2 }
 0x366   :  { %548 = vrot.lane.b32.xlu2 %v1585_v10, %s1086_s29 }
 0x368   :  { %1067 = vrot.lane.b32.xlu0 %v1056_v38, %s1087_s30  ;;  %1042 = vrot.lane.b32.xlu1 %v1046_v57, %s1084_s28 }
 0x36e   :  { %1072 = vrot.lane.b32.xlu2 %v1056_v38, %s1089_s13 }
 0x370   :  { %516 = vrot.lane.b32.xlu0 %v1585_v10, %s1089_s13  ;;  %596 = vrot.lane.b32.xlu1 %v1585_v10, %s1083_s1 }
 0x376   :  { %592 = vrot.lane.b32.xlu2 %v1591_v1, %s1083_s1 }
 0x378   :  { %560 = vrot.lane.b32.xlu0 %v1591_v1, %s1088_s12  ;;  %1052 = vrot.lane.b32.xlu1 %v1046_v57, %s1088_s12 }
 0x37e   :  { %542 = vrot.lane.b32.xlu2 %v1581_v3, %s1086_s29 }
 0x380   :  { %494 = vrot.lane.b32.xlu0 %v1581_v3, %s1087_s30  ;;  %564 = vrot.lane.b32.xlu1 %v1585_v10, %s1088_s12 }
 0x388   :  { %1062 = vrot.lane.b32.xlu1 %v1056_v38, %s1086_s29 }
 0x390   :  { %500 = vrot.lane.b32.xlu1 %v1585_v10, %s1087_s30 }
 0x398   :  { %576 = vrot.lane.b32.xlu1 %v1591_v1, %s1084_s28 }
 0x3a0   :  { %526 = vrot.lane.b32.xlu1 %v1581_v3, %s1090_s14 }
 0x3a8   :  { %510 = vrot.lane.b32.xlu1 %v1581_v3, %s1089_s13 }
 0x3b0   :  { %735 = vperm.xlu1 %950, %v727_v60   ;;  %v581_v9 = vpop.permute.xlu2 %580 }
 0x3b8   :  { %v1679_v38 = vpop.permute.xlu2 %1057 }
 0x3ca   :  { %v1033_v58 = vpop.permute.xlu1 %1032  ;;  %v1657_v12 = vpop.permute.xlu0 %1047 }
 0x3cb   :  { %v1035_v14 = vunpack.i.h.bf16 %v1033_v58  ;;  %v1034_v15 = vunpack.i.l.bf16 %v1033_v58  ;;  %v1050_v41 = vunpack.i.h.bf16 %v1657_v12  ;;  %v1049_v42 = vunpack.i.l.bf16 %v1657_v12  ;;  %v1690_v58 = vpop.permute.xlu2 %548 }
 0x3d2   :  { %v1038_v2 = vpop.permute.xlu1 %1037  ;;  %v1688_v60 = vpop.permute.xlu0 %532 }
 0x3d3   :  { %v1040_v16 = vunpack.i.h.bf16 %v1038_v2  ;;  %v1039_v18 = vunpack.i.l.bf16 %v1038_v2 }
 0x3d5   :  { %v616_v19 = vsel %vm1978_vm5, %v1034_v15, %v1040_v16  ;;  %v615_v20 = vsel %vm1979_vm11, %v1040_v16, %v1035_v14  ;;  %v614_v21 = vsel %vm1980_vm0, %v1035_v14, %v1039_v18  ;;  %v617_v23 = vsel %vm1981_vm13, %v1039_v18, %v1034_v15 }
 0x3d6   :  { %v618_v24 = vsel %vm1982_vm6, %v616_v19, 0.0  ;;  %v619_v26 = vsel %vm1247_vm10, %v615_v20, 0.0  ;;  %v620_v63 = vsel %vm1983_vm9, %v614_v21, 0.0  ;;  %v621_v27 = vsel %vm1256_vm12, %v617_v23, 0.0  ;;  %v1706_v21 = vpop.permute.xlu2 %1072 }
 0x3d7   :  { %v638_v29 = vpack.c.bf16 %v618_v24, %v618_v24  ;;  %v639_v31 = vpack.c.bf16 %v619_v26, %v619_v26  ;;  %v640_v32 = vpack.c.bf16 %v620_v63, %v620_v63  ;;  %v641_v0 = vpack.c.bf16 %v621_v27, %v621_v27 }
 0x3d8   :  { %vm1984_vm5 = vcmask 1043456   ;;  %vm1988_vm12 = vcmp.lt.s32.totalorder %v1205_v51, 113  ;;  %vm1990_vm6 = vcmp.lt.s32.totalorder %v1205_v51, 112  ;;  %v1060_v19 = vunpack.i.h.bf16 %v1679_v38 }
 0x3d9   :  { %v653_v33 = vsel %vm1984_vm5, %v638_v29, 0  ;;  %vm1985_vm11 = vmmov %vm1984_vm5  ;;  %v1059_v20 = vunpack.i.l.bf16 %v1679_v38  ;;  %v1075_v63 = vunpack.i.h.bf16 %v1706_v21 }
 0x3da   :  { %v656_v36 = vsel %vm1985_vm11, %v639_v31, 0  ;;  %vm1986_vm0 = vmmov %vm1984_vm5  ;;  %v1654_v44 = vpop.permute.xlu1 %1042  ;;  %667 = vmatpush.bf16.msrb.mxu0 %v653_v33  ;;  %vm1992_vm5 = vnez %v1905_v37  ;;  %v1698_v18 = vpop.permute.xlu0 %1067 }
 0x3db   :  { %v659_v4 = vsel %vm1986_vm0, %v640_v32, 0  ;;  %680 = vmatpush.bf16.msrb.mxu1 %v656_v36  ;;  %vm1987_vm10 = vmmov %vm1986_vm0  ;;  %v1045_v45 = vunpack.i.h.bf16 %v1654_v44  ;;  %v1044_v62 = vunpack.i.l.bf16 %v1654_v44  ;;  %vm1994_vm0 = vcmp.lt.s32.totalorder %v1205_v51, 127 }
 0x3dc   :  { %v662_v56 = vsel %vm1987_vm10, %v641_v0, 0  ;;  %693 = vmatpush.bf16.msrb.mxu2 %v659_v4  ;;  %vm1989_vm9 = vmmov %vm1988_vm12  ;;  %v1070_v24 = vunpack.i.h.bf16 %v1698_v18 }
 0x3dd   :  { %706 = vmatpush.bf16.msrb.mxu3 %v662_v56  ;;  %v582_v53 = vsel %vm1988_vm12, %v1045_v45, %v581_v9  ;;  %v585_v54 = vsel %vm1989_vm9, %v581_v9, %v1044_v62  ;;  %vm1991_vm13 = vmmov %vm1990_vm6  ;;  %vm1998_vm12 = vcmp.lt.s32.totalorder %v1205_v51, 15 }
 0x3de   :  { %vm1993_vm11 = vmpackc.low %vm1237_vm8, %vm1352_vm14  ;;  %vm1996_vm8 = vnez %v1907_v46  ;;  %vm1997_vm14 = vnez %v1939_v35  ;;  %v535_v46 = vsel %vm1998_vm12, %v1059_v20, %v1060_v19  ;;  %v1074_v35 = vunpack.i.l.bf16 %v1706_v21  ;;  %v939_v21 = vld [vmem:[%s1861_s9] sm:$0xff] }
 0x3df   :  { %vm1995_vm10 = vmmov %vm1994_vm0 }
 0x3e0   :  { %vm1999_vm9 = vmmov %vm1998_vm12 }
 0x3e1   :  { %v534_v27 = vsel %vm1999_vm9, %v1060_v19, %v1688_v60  ;;  %vm2010_vm9 = vcmp.lt.s32.totalorder %v1205_v51, 112 }
 0x3e2   :  { %v597_v52 = vpop.permute.xlu1 %596  ;;  %v517_v36 = vpop.permute.xlu0 %516 }
 0x3e3   :  { %v598_v55 = vsel %vm1990_vm6, %v1050_v41, %v597_v52  ;;  %v601_v59 = vsel %vm1991_vm13, %v597_v52, %v1049_v42  ;;  %vm2000_vm6 = vcmp.lt.s32.totalorder %v1205_v51, 1  ;;  %v643_v52 = vld [vmem:[%s1859_s8] sm:$0xff] }
 0x3e4   :  { %v906_v11 = vpack.c.bf16 %v598_v55, %v582_v53  ;;  %v919_v57 = vpack.c.bf16 %v601_v59, %v585_v54  ;;  %vm2001_vm13 = vmmov %vm2000_vm6  ;;  %646 = vperm.xlu2 %1076, %v643_v52   ;;  %v593_v55 = vpop.permute.xlu2 %592 }
 0x3e5   :  { %v599_v47 = vsel %vm2010_vm9, %v593_v55, %v1050_v41 }
 0x3e6   :  { %907 = vmatpush.bf16.msk.msrb.mxu2 %vm1992_vm5, %v906_v11  ;;  %920 = vmatpush.bf16.msk.msrb.mxu3 %vm1993_vm11, %v919_v57  ;;  %vm2002_vm5 = vcmp.lt.s32.totalorder %v1205_v51, 17  ;;  %vm2003_vm11 = vnez %v1922_v13 }
 0x3ea   :  { %v1053_v40 = vpop.permute.xlu1 %1052  ;;  %v561_v57 = vpop.permute.xlu0 %560 }
 0x3eb   :  { %v1055_v2 = vunpack.i.h.bf16 %v1053_v40  ;;  %v1054_v14 = vunpack.i.l.bf16 %v1053_v40 }
 0x3ec   :  { %v543_v44 = vpop.permute.xlu2 %542 }
 0x3f2   :  { %v565_v15 = vpop.permute.xlu1 %564 }
 0x3f3   :  { %v566_v16 = vsel %vm1994_vm0, %v1055_v2, %v565_v15  ;;  %v569_v37 = vsel %vm1995_vm10, %v565_v15, %v1054_v14  ;;  %vm2004_vm0 = vcmp.lt.s32.totalorder %v1205_v51, 16 }
 0x3f4   :  { %v909_v6 = vpack.c.bf16 %v566_v16, %v1583_v8  ;;  %v922_v61 = vpack.c.bf16 %v569_v37, %v1585_v10  ;;  %v1069_v8 = vunpack.i.l.bf16 %v1698_v18  ;;  %v519_v4 = vsel %vm2004_vm0, %v1074_v35, %v1075_v63  ;;  %vm2005_vm10 = vmmov %vm2004_vm0 }
 0x3f5   :  { %v518_v53 = vsel %vm2005_vm10, %v1075_v63, %v517_v36  ;;  %vm2018_vm0 = vnez %v1913_v49 }
 0x3f6   :  { %910 = vmatpush.bf16.msk.msrb.mxu2 %vm1996_vm8, %v909_v6  ;;  %923 = vmatpush.bf16.msk.msrb.mxu3 %vm1997_vm14, %v922_v61  ;;  %v503_v33 = vsel %vm2002_vm5, %v1069_v8, %v1070_v24  ;;  %vm2006_vm8 = vmmov %vm2002_vm5  ;;  %vm2008_vm14 = vcmask 588800   ;;  %vm2016_vm5 = vnez %v1911_v48 }
 0x3f7   :  { %v915_v9 = vpack.c.bf16 %v519_v4, %v503_v33  ;;  %vm2009_vm12 = vmmov %vm2008_vm14 }
 0x3fa   :  { %v1063_v23 = vpop.permute.xlu1 %1062 }
 0x3fb   :  { %v1065_v10 = vunpack.i.h.bf16 %v1063_v23  ;;  %v1064_v26 = vunpack.i.l.bf16 %v1063_v23 }
 0x3fd   :  { %v551_v29 = vsel %vm2000_vm6, %v1064_v26, %v1065_v10  ;;  %v550_v31 = vsel %vm2001_vm13, %v1065_v10, %v1690_v58  ;;  %vm2014_vm6 = vcmp.lt.s32.totalorder %v1205_v51, 127 }
 0x3fe   :  { %v912_v32 = vpack.c.bf16 %v551_v29, %v535_v46  ;;  %v925_v0 = vpack.c.bf16 %v550_v31, %v534_v27  ;;  %v568_v41 = vsel %vm2014_vm6, %v1054_v14, %v561_v57  ;;  %vm2015_vm13 = vmmov %vm2014_vm6 }
 0x3ff   :  { %v567_v12 = vsel %vm2015_vm13, %v561_v57, %v1055_v2  ;;  %vm2029_vm13 = vcmp.lt.s32.totalorder %v1205_v51, 16 }
 0x400   :  { %913 = vmatpush.bf16.msk.msrb.mxu2 %vm2003_vm11, %v912_v32  ;;  %926 = vmatpush.bf16.msk.msrb.mxu3 %vm1487_vm3, %v925_v0  ;;  %vm2007_vm3 = vmpackc.low %vm1309_vm7, %vm1520_vm15  ;;  %vm2012_vm15 = vcmp.lt.s32.totalorder %v1205_v51, 113  ;;  %vm2017_vm11 = vnez %v1897_v5 }
 0x401   :  { %vm2011_vm7 = vmmov %vm2010_vm9 }
 0x402   :  { %v501_v56 = vpop.permute.xlu1 %500  ;;  %v600_v17 = vsel %vm2011_vm7, %v1049_v42, %v593_v55  ;;  %vm2019_vm10 = vmpackc.low %vm2017_vm11, %vm2018_vm0  ;;  %vm2032_vm11 = vnez %v1960_v50 }
 0x403   :  { %v502_v54 = vsel %vm2006_vm8, %v1070_v24, %v501_v56  ;;  %vm2020_vm8 = vnez %v1928_v25 }
 0x404   :  { %v928_v13 = vpack.c.bf16 %v518_v53, %v502_v54  ;;  %916 = vmatpush.bf16.msk.msrb.mxu2 %vm2007_vm3, %v915_v9  ;;  %vm2021_vm3 = vnez %v1933_v28  ;;  %v495_v28 = vpop.permute.xlu0 %494 }
 0x406   :  { %929 = vmatpush.bf16.msk.msrb.mxu3 %vm1558_vm4, %v928_v13  ;;  %vm2013_vm4 = vmmov %vm2012_vm15 }
 0x407   :  { %917 = vmatmul.msk.bf16.vlgmr.msrb.gmra.mxu2 %vm2008_vm14, %v642_v7  ;;  %vm2022_vm14 = vcmp.lt.s32.totalorder %v1205_v51, 1 }
 0x408   :  { %v553_v5 = vsel %vm2022_vm14, %v1690_v58, %v543_v44  ;;  %vm2025_vm7 = vmmov %vm2022_vm14 }
 0x409   :  { %930 = vmatmul.msk.bf16.vlgmr.msrb.gmra.mxu3 %vm2009_vm12, %v642_v7  ;;  %vm2023_vm12 = vcmp.lt.s32.totalorder %v1205_v51, 15 }
 0x40a   :  { %v577_v59 = vpop.permute.xlu1 %576  ;;  %vm2024_vm9 = vmmov %vm2023_vm12 }
 0x40b   :  { %v583_v34 = vsel %vm2012_vm15, %v577_v59, %v1045_v45  ;;  %v584_v11 = vsel %vm2013_vm4, %v1044_v62, %v577_v59  ;;  %v883_v45 = vpack.c.bf16 %v568_v41, %v1581_v3  ;;  %v896_v62 = vpack.c.bf16 %v567_v12, %v1591_v1 }
 0x40c   :  { %v880_v38 = vpack.c.bf16 %v600_v17, %v584_v11  ;;  %v893_v40 = vpack.c.bf16 %v599_v47, %v583_v34  ;;  %v552_v3 = vsel %vm2025_vm7, %v543_v44, %v1064_v26  ;;  %vm2026_vm15 = vnez %v1949_v39 }
 0x40d   :  { %vm2027_vm4 = vcmp.lt.s32.totalorder %v1205_v51, 17  ;;  %v726_v51 = vld [vmem:[%s1858_s10] sm:$0xff] }
 0x40e   :  { %881 = vmatpush.bf16.msk.msrb.mxu0 %vm2016_vm5, %v880_v38  ;;  %894 = vmatpush.bf16.msk.msrb.mxu1 %vm2019_vm10, %v893_v40  ;;  %v504_v2 = vsel %vm2027_vm4, %v495_v28, %v1069_v8  ;;  %vm2028_vm6 = vmmov %vm2027_vm4  ;;  %vm2034_vm10 = vcmask 588800  }
 0x40f   :  { %v505_v14 = vsel %vm2028_vm6, %v501_v56, %v495_v28  ;;  %vm2030_vm5 = vmmov %vm2029_vm13  ;;  %730 = vperm.xlu0 %1077, %v726_v51  }
 0x412   :  { %v527_v42 = vpop.permute.xlu1 %526  ;;  %884 = vmatpush.bf16.msk.msrb.mxu0 %vm2020_vm8, %v883_v45  ;;  %897 = vmatpush.bf16.msk.msrb.mxu1 %vm2021_vm3, %v896_v62  ;;  %vm2035_vm8 = vmmov %vm2034_vm10  ;;  %vm2036_vm3 = vcmask 1043456  }
 0x413   :  { %v536_v48 = vsel %vm2023_vm12, %v527_v42, %v1059_v20  ;;  %v537_v49 = vsel %vm2024_vm9, %v1688_v60, %v527_v42  ;;  %vm2037_vm14 = vmmov %vm2036_vm3 }
 0x414   :  { %v886_v1 = vpack.c.bf16 %v553_v5, %v537_v49  ;;  %v899_v25 = vpack.c.bf16 %v552_v3, %v536_v48  ;;  %vm2038_vm12 = vmmov %vm2036_vm3 }
 0x415   :  { %vm2039_vm9 = vmmov %vm2036_vm3 }
 0x416   :  { %887 = vmatpush.bf16.msk.msrb.mxu0 %vm1457_vm1, %v886_v1  ;;  %900 = vmatpush.bf16.msk.msrb.mxu1 %vm2026_vm15, %v899_v25  ;;  %vm2031_vm1 = vnez %v1936_v30 }
 0x417   :  { %vm2033_vm0 = vmpackc.low %vm2031_vm1, %vm2032_vm11 }
 0x41a   :  { %v511_v58 = vpop.permute.xlu1 %510 }
 0x41b   :  { %v520_v60 = vsel %vm2029_vm13, %v511_v58, %v1074_v35  ;;  %v521_v15 = vsel %vm2030_vm5, %v517_v36, %v511_v58 }
 0x41c   :  { %v889_v16 = vpack.c.bf16 %v521_v15, %v505_v14  ;;  %v902_v43 = vpack.c.bf16 %v520_v60, %v504_v2 }
 0x41e   :  { %890 = vmatpush.bf16.msk.msrb.mxu0 %vm2033_vm0, %v889_v16  ;;  %903 = vmatpush.bf16.msk.msrb.mxu1 %vm1537_vm2, %v902_v43  ;;  %vm743_vm2 = vcmask 64512  }
 0x421   :  { %891 = vmatmul.msk.bf16.vlgmr.msrb.gmra.mxu0 %vm2034_vm10, %v642_v7  ;;  %904 = vmatmul.msk.bf16.vlgmr.msrb.gmra.mxu1 %vm2035_vm8, %v642_v7 }
 0x422   :  { %v736_v54 = vpop.permute.xlu1 %735 }
 0x43e   :  { %v647_v39 = vpop.permute.xlu2 %646 }
 0x481   :  { %v731_v4 = vpop.permute.xlu0 %730 }
 0x48a   :  { %v699_v37 = vpop.f32.mrf.mxu2 }
 0x48b   :  { %v700_v6 = vadd.f32 %v699_v37, %v647_v39 }
 0x48c   :  { %v712_v30 = vpop.f32.mrf.mxu3 }
 0x48d   :  { %v718_v61 = vmax.f32 %v700_v6, 0.0  ;;  %v713_v50 = vadd.f32 %v712_v30, %v647_v39 }
 0x48f   :  { %v724_v18 = vpack.c.bf16 %v718_v61, %v718_v61  ;;  %v719_v19 = vmax.f32 %v713_v50, 0.0 }
 0x491   :  { %v725_v20 = vpack.c.bf16 %v719_v19, %v719_v19  ;;  %v754_v22 = vsel %vm2036_vm3, %v724_v18, 0 }
 0x492   :  { %794 = vmatpush.bf16.msra.mxu2 %v754_v22  ;;  %v701_v23 = vpop.f32.mrf.mxu2 }
 0x493   :  { %v757_v24 = vsel %vm2037_vm14, %v725_v20, 0 }
 0x494   :  { %808 = vmatpush.bf16.msra.mxu3 %v757_v24  ;;  %v714_v8 = vpop.f32.mrf.mxu3 }
 0x495   :  { %937 = vmatmul.msk.bf16.vlgmr.msra.gmra.mxu2 %vm743_vm2, %v939_v21 }
 0x497   :  { %938 = vmatmul.msk.bf16.vlgmr.msra.gmra.mxu3 %vm743_vm2, %v939_v21 }
 0x49e   :  { %v673_v10 = vpop.f32.mrf.mxu0  ;;  %v686_v26 = vpop.f32.mrf.mxu1 }
 0x49f   :  { %v674_v63 = vadd.f32 %v673_v10, %v647_v39  ;;  %v687_v46 = vadd.f32 %v686_v26, %v647_v39 }
 0x4a1   :  { %v716_v35 = vmax.f32 %v674_v63, 0.0  ;;  %v717_v27 = vmax.f32 %v687_v46, 0.0 }
 0x4a3   :  { %v722_v29 = vpack.c.bf16 %v716_v35, %v716_v35  ;;  %v723_v31 = vpack.c.bf16 %v717_v27, %v717_v27 }
 0x4a5   :  { %v748_v32 = vsel %vm2038_vm12, %v722_v29, 0  ;;  %v751_v0 = vsel %vm2039_vm9, %v723_v31, 0 }
 0x4a6   :  { %v675_v33 = vpop.f32.mrf.mxu0  ;;  %v688_v36 = vpop.f32.mrf.mxu1  ;;  %766 = vmatpush.bf16.msra.mxu0 %v748_v32  ;;  %780 = vmatpush.bf16.msra.mxu1 %v751_v0 }
 0x4a9   :  { %935 = vmatmul.msk.bf16.vlgmr.msra.gmra.mxu0 %vm743_vm2, %v939_v21  ;;  %936 = vmatmul.msk.bf16.vlgmr.msra.gmra.mxu1 %vm743_vm2, %v939_v21 }
 0x518   :  { %v796_v56 = vpop.f32.mrf.mxu2 }
 0x519   :  { %v797_v9 = vadd.f32 %v796_v56, %v731_v4 }
 0x51a   :  { %v810_v52 = vpop.f32.mrf.mxu3 }
 0x51b   :  { %v811_v53 = vadd.f32 %v810_v52, %v731_v4  ;;  %817 = vst [vmem:[%s1862_s11 + $0x10] sm:$0xff] %v797_v9 }
 0x51d   :  { %818 = vst [vmem:[%s1862_s11 + $0x18] sm:$0xff] %v811_v53 }
 0x520   :  { %v798_v13 = vpop.f32.mrf.mxu2 }
 0x521   :  { %v799_v7 = vadd.f32 %v798_v13, %v736_v54 }
 0x522   :  { %v812_v55 = vpop.f32.mrf.mxu3 }
 0x523   :  { %821 = vst [vmem:[%s1862_s11 + $0x30] sm:$0xff] %v799_v7  ;;  %v813_v59 = vadd.f32 %v812_v55, %v736_v54 }
 0x525   :  { %822 = vst [vmem:[%s1862_s11 + $0x38] sm:$0xff] %v813_v59 }
 0x526   :  { %v768_v47 = vpop.f32.mrf.mxu0  ;;  %v782_v17 = vpop.f32.mrf.mxu1 }
 0x527   :  { %v769_v34 = vadd.f32 %v768_v47, %v731_v4  ;;  %v783_v11 = vadd.f32 %v782_v17, %v731_v4 }
 0x529   :  { %815 = vst [vmem:[%s1862_s11] sm:$0xff] %v769_v34 }
 0x52a   :  { %816 = vst [vmem:[%s1862_s11 + $0x8] sm:$0xff] %v783_v11 }
 0x52e   :  { %v770_v57 = vpop.f32.mrf.mxu0  ;;  %v784_v38 = vpop.f32.mrf.mxu1 }
 0x52f   :  { %v771_v40 = vadd.f32 %v770_v57, %v736_v54  ;;  %v785_v41 = vadd.f32 %v784_v38, %v736_v54 }
 0x531   :  { %819 = vst [vmem:[%s1862_s11 + $0x20] sm:$0xff] %v771_v40 }
 0x532   :  { %820 = vst [vmem:[%s1862_s11 + $0x28] sm:$0xff] %v785_v41 }

</bundles_post_ra>
